<compile_context>
chip_gen: v5e
topology: v5e:2x2
jax: 0.10.0
libtpu: 0.0.40
codegen_flags: <defaults>
</compile_context>

<pallas_src>
import functools

import jax
import jax.numpy as jnp
from jax import lax
from jax.experimental import pallas as pl
from jax.experimental.pallas import tpu as pltpu

_EPS = 1e-8            # torch.nn.functional.cosine_similarity default eps
_EPS2 = _EPS * _EPS

# VMEM budget for the *input* pipeline buffers (4 inputs x 2 buffers each).
# Conservative for v7x's 64 MiB physical VMEM while keeping v5e/v6e row tiles
# large enough to sit near the HBM roofline (per-step overhead amortized).
_INPUT_VMEM_BUDGET = 16 * 1024 * 1024
_VMEM_LIMIT_BYTES = 32 * 1024 * 1024


def _cosent_kernel(ui_ref, uj_ref, uk_ref, ul_ref, out_ref, *, lambda_, lane_out):
    # In-kernel upcast only; callers keep HBM traffic in the native dtype.
    ui = ui_ref[...].astype(jnp.float32)
    uj = uj_ref[...].astype(jnp.float32)
    uk = uk_ref[...].astype(jnp.float32)
    ul = ul_ref[...].astype(jnp.float32)

    # Row-wise cosine similarity along the hidden (lane) axis.
    # PyTorch: dot / (max(||x||, eps) * max(||y||, eps)).  sqrt is monotone, so
    # clamp the squared norms at eps^2 and use a single rsqrt (one EUP push
    # instead of 2x sqrt + 1x divide).
    def cos_sim(a, b):
        dot = jnp.sum(a * b, axis=-1, keepdims=True)
        na2 = jnp.sum(a * a, axis=-1, keepdims=True)
        nb2 = jnp.sum(b * b, axis=-1, keepdims=True)
        denom2 = jnp.maximum(na2, _EPS2) * jnp.maximum(nb2, _EPS2)
        return dot * lax.rsqrt(denom2)

    cos_pos = cos_sim(ui, uj)  # (TB, 1)
    cos_neg = cos_sim(uk, ul)  # (TB, 1)

    # Stable softplus: log1p(exp(x)) == max(x, 0) + log1p(exp(-|x|)).
    x = lambda_ * (cos_neg - cos_pos)
    sp = jnp.maximum(x, 0.0) + jnp.log1p(jnp.exp(-jnp.abs(x)))  # (TB, 1)

    if lane_out:
        # Lane-dense store: (TB, 1) -> (1, TB) so the out tile is written with
        # unmasked full-lane stores (XLU transpose is off the DMA-bound path).
        out_ref[...] = jnp.transpose(sp)
    else:
        out_ref[...] = sp


def _pick_batch_tile(B, D, itemsize):
    """Largest row tile whose 4x2 pipeline buffers fit the VMEM budget.

    Prefers a multiple of 128 (enables the lane-dense output layout); falls back
    to a multiple of 8 only for extreme hidden sizes.
    """
    tb = _INPUT_VMEM_BUDGET // (4 * 2 * D * itemsize)
    if tb >= B:
        return B                      # full-extent block is always legal
    if tb >= 128:
        return min((tb // 128) * 128, 1024)   # amortization saturates ~1024
    return max(8, (tb // 8) * 8)      # huge-D fallback (sublane output layout)


def cosent_loss(u_i, u_j, u_k, u_l, lambda_, *, tile_rows=None):
    """Pallas CoSENT per-pair loss. Inputs: (B, D) any float dtype. Returns (B,) f32."""
    B, D = u_i.shape
    assert u_j.shape == (B, D) and u_k.shape == (B, D) and u_l.shape == (B, D)

    if tile_rows is None:
        tb = _pick_batch_tile(B, D, jnp.dtype(u_i.dtype).itemsize)
    else:
        tb = min(int(tile_rows), B)
        assert tb == B or tb % 8 == 0, "tile_rows must be a multiple of 8 (or >= B)"

    # Lane-dense (1, B) output is legal when the block's last dim is a multiple
    # of 128 or the full extent; otherwise fall back to the (B, 1) layout.
    lane_out = (tb == B) or (tb % 128 == 0)

    grid = (pl.cdiv(B, tb),)
    kernel = functools.partial(_cosent_kernel, lambda_=float(lambda_),
                               lane_out=lane_out)

    vec_spec = pl.BlockSpec((tb, D), lambda i: (i, 0))
    if lane_out:
        out_shape = jax.ShapeDtypeStruct((1, B), jnp.float32)
        out_spec = pl.BlockSpec((1, tb), lambda i: (0, i))
    else:
        # Output bytes are ~1/(4*D) of input traffic, so the masked-store
        # fallback is still far off the DMA-bound critical path.
        out_shape = jax.ShapeDtypeStruct((B, 1), jnp.float32)
        out_spec = pl.BlockSpec((tb, 1), lambda i: (i, 0))

    out = pl.pallas_call(
        kernel,
        out_shape=out_shape,
        grid_spec=pltpu.PrefetchScalarGridSpec(
            num_scalar_prefetch=0,
            grid=grid,
            in_specs=[vec_spec, vec_spec, vec_spec, vec_spec],
            out_specs=out_spec,
        ),
        compiler_params=pltpu.CompilerParams(
            dimension_semantics=("parallel",),
            vmem_limit_bytes=_VMEM_LIMIT_BYTES,
        ),
    )(u_i, u_j, u_k, u_l)

    return out[0] if lane_out else out[:, 0]


def _ref_loss(a, b, c, d, lam):
    """Pure-JAX reference matching torch.nn.functional.cosine_similarity math."""
    def cos(x, y):
        dot = jnp.sum(x * y, axis=-1)
        nx = jnp.maximum(jnp.linalg.norm(x, axis=-1), _EPS)
        ny = jnp.maximum(jnp.linalg.norm(y, axis=-1), _EPS)
        return dot / (nx * ny)
    return jnp.log1p(jnp.exp(lam * (cos(c, d) - cos(a, b))))


if __name__ == "__main__":
    LAMBDA = 20.0  # lambda_ hyperparameter from __init__

    key = jax.random.PRNGKey(0)
    k1, k2, k3, k4, k5, k6, k7, k8 = jax.random.split(key, 8)

    # --- small shape, single full-extent tile (lane-dense output) -------
    B, D = 8, 128
    u_i = jax.random.normal(k1, (B, D), dtype=jnp.float32)
    u_j = jax.random.normal(k2, (B, D), dtype=jnp.float32)
    u_k = jax.random.normal(k3, (B, D), dtype=jnp.float32)
    u_l = jax.random.normal(k4, (B, D), dtype=jnp.float32)

    loss = cosent_loss(u_i, u_j, u_k, u_l, LAMBDA)
    jax.block_until_ready(loss)
    ref = _ref_loss(u_i, u_j, u_k, u_l, LAMBDA)
    assert loss.shape == (B,)
    assert jnp.allclose(loss, ref, atol=1e-5, rtol=1e-5)

    # --- multi-step pipelined grid, lane-dense output (tile_rows=128) ---
    B2 = 256
    v_i = jax.random.normal(k5, (B2, D), dtype=jnp.float32)
    v_j = jax.random.normal(k6, (B2, D), dtype=jnp.float32)
    v_k = jax.random.normal(k7, (B2, D), dtype=jnp.float32)
    v_l = jax.random.normal(k8, (B2, D), dtype=jnp.float32)
    loss2 = cosent_loss(v_i, v_j, v_k, v_l, LAMBDA, tile_rows=128)  # grid=(2,)
    jax.block_until_ready(loss2)
    ref2 = _ref_loss(v_i, v_j, v_k, v_l, LAMBDA)
    assert loss2.shape == (B2,)
    assert jnp.allclose(loss2, ref2, atol=1e-5, rtol=1e-5)

    # --- sublane-output fallback path (tile not a multiple of 128) ------
    loss3 = cosent_loss(v_i[:32], v_j[:32], v_k[:32], v_l[:32], LAMBDA,
                        tile_rows=8)  # grid=(4,), (B,1) output layout
    jax.block_until_ready(loss3)
    assert loss3.shape == (32,)
    assert jnp.allclose(loss3, ref2[:32], atol=1e-5, rtol=1e-5)

    # --- bf16 inputs flow straight through (no wrapper-side upcast) -----
    loss_bf16 = cosent_loss(
        u_i.astype(jnp.bfloat16), u_j.astype(jnp.bfloat16),
        u_k.astype(jnp.bfloat16), u_l.astype(jnp.bfloat16), LAMBDA)
    jax.block_until_ready(loss_bf16)
    assert loss_bf16.shape == (B,)
    assert bool(jnp.all(jnp.isfinite(loss_bf16)))

    print("KERNEL_OK")
</pallas_src>

<mosaic_0001>
module attributes {stable_mosaic.version = 11 : i64} {
  func.func @_cosent_kernel(%arg0: i32, %arg1: memref<8x128xf32, #tpu.memory_space<vmem>>, %arg2: memref<8x128xf32, #tpu.memory_space<vmem>>, %arg3: memref<8x128xf32, #tpu.memory_space<vmem>>, %arg4: memref<8x128xf32, #tpu.memory_space<vmem>>, %arg5: memref<1x8xf32, #tpu.memory_space<vmem>>) attributes {dimension_semantics = [#tpu.dimension_semantics<parallel>], iteration_bounds = array<i64: 1>, scalar_prefetch = 0 : i64, scratch_operands = 0 : i64, tpu.core_type = #tpu.core_type<tc>, window_params = [{transform_indices = @transform_0, window_bounds = array<i64: 8, 128>}, {transform_indices = @transform_1, window_bounds = array<i64: 8, 128>}, {transform_indices = @transform_2, window_bounds = array<i64: 8, 128>}, {transform_indices = @transform_3, window_bounds = array<i64: 8, 128>}, {transform_indices = @transform_4, window_bounds = array<i64: 1, 8>}]} {
    %c0 = arith.constant 0 : index
    %c0_0 = arith.constant 0 : index
    %0 = vector.load %arg1[%c0, %c0_0] : memref<8x128xf32, #tpu.memory_space<vmem>>, vector<8x128xf32>
    %c0_1 = arith.constant 0 : index
    %c0_2 = arith.constant 0 : index
    %1 = vector.load %arg2[%c0_1, %c0_2] : memref<8x128xf32, #tpu.memory_space<vmem>>, vector<8x128xf32>
    %c0_3 = arith.constant 0 : index
    %c0_4 = arith.constant 0 : index
    %2 = vector.load %arg3[%c0_3, %c0_4] : memref<8x128xf32, #tpu.memory_space<vmem>>, vector<8x128xf32>
    %c0_5 = arith.constant 0 : index
    %c0_6 = arith.constant 0 : index
    %3 = vector.load %arg4[%c0_5, %c0_6] : memref<8x128xf32, #tpu.memory_space<vmem>>, vector<8x128xf32>
    %4 = arith.mulf %0, %1 : vector<8x128xf32>
    %cst = arith.constant dense<0.000000e+00> : vector<8xf32>
    %5 = vector.multi_reduction <add>, %4, %cst [1] : vector<8x128xf32> to vector<8xf32>
    %6 = vector.shape_cast %5 : vector<8xf32> to vector<8x1xf32>
    %7 = arith.mulf %0, %0 : vector<8x128xf32>
    %cst_7 = arith.constant dense<0.000000e+00> : vector<8xf32>
    %8 = vector.multi_reduction <add>, %7, %cst_7 [1] : vector<8x128xf32> to vector<8xf32>
    %9 = vector.shape_cast %8 : vector<8xf32> to vector<8x1xf32>
    %10 = arith.mulf %1, %1 : vector<8x128xf32>
    %cst_8 = arith.constant dense<0.000000e+00> : vector<8xf32>
    %11 = vector.multi_reduction <add>, %10, %cst_8 [1] : vector<8x128xf32> to vector<8xf32>
    %12 = vector.shape_cast %11 : vector<8xf32> to vector<8x1xf32>
    %cst_9 = arith.constant 1.000000e-16 : f32
    %13 = vector.broadcast %cst_9 : f32 to vector<8x1xf32>
    %14 = arith.maximumf %9, %13 : vector<8x1xf32>
    %cst_10 = arith.constant 1.000000e-16 : f32
    %15 = vector.broadcast %cst_10 : f32 to vector<8x1xf32>
    %16 = arith.maximumf %12, %15 : vector<8x1xf32>
    %17 = arith.mulf %14, %16 : vector<8x1xf32>
    %18 = math.rsqrt %17 : vector<8x1xf32>
    %19 = arith.mulf %6, %18 : vector<8x1xf32>
    %20 = arith.mulf %2, %3 : vector<8x128xf32>
    %cst_11 = arith.constant dense<0.000000e+00> : vector<8xf32>
    %21 = vector.multi_reduction <add>, %20, %cst_11 [1] : vector<8x128xf32> to vector<8xf32>
    %22 = vector.shape_cast %21 : vector<8xf32> to vector<8x1xf32>
    %23 = arith.mulf %2, %2 : vector<8x128xf32>
    %cst_12 = arith.constant dense<0.000000e+00> : vector<8xf32>
    %24 = vector.multi_reduction <add>, %23, %cst_12 [1] : vector<8x128xf32> to vector<8xf32>
    %25 = vector.shape_cast %24 : vector<8xf32> to vector<8x1xf32>
    %26 = arith.mulf %3, %3 : vector<8x128xf32>
    %cst_13 = arith.constant dense<0.000000e+00> : vector<8xf32>
    %27 = vector.multi_reduction <add>, %26, %cst_13 [1] : vector<8x128xf32> to vector<8xf32>
    %28 = vector.shape_cast %27 : vector<8xf32> to vector<8x1xf32>
    %cst_14 = arith.constant 1.000000e-16 : f32
    %29 = vector.broadcast %cst_14 : f32 to vector<8x1xf32>
    %30 = arith.maximumf %25, %29 : vector<8x1xf32>
    %cst_15 = arith.constant 1.000000e-16 : f32
    %31 = vector.broadcast %cst_15 : f32 to vector<8x1xf32>
    %32 = arith.maximumf %28, %31 : vector<8x1xf32>
    %33 = arith.mulf %30, %32 : vector<8x1xf32>
    %34 = math.rsqrt %33 : vector<8x1xf32>
    %35 = arith.mulf %22, %34 : vector<8x1xf32>
    %36 = arith.subf %35, %19 : vector<8x1xf32>
    %cst_16 = arith.constant 2.000000e+01 : f32
    %37 = vector.broadcast %cst_16 : f32 to vector<8x1xf32>
    %38 = arith.mulf %37, %36 : vector<8x1xf32>
    %cst_17 = arith.constant 0.000000e+00 : f32
    %39 = vector.broadcast %cst_17 : f32 to vector<8x1xf32>
    %40 = arith.maximumf %38, %39 : vector<8x1xf32>
    %41 = math.absf %38 : vector<8x1xf32>
    %cst_18 = arith.constant 0.000000e+00 : f32
    %42 = vector.broadcast %cst_18 : f32 to vector<8x1xf32>
    %43 = arith.subf %42, %41 : vector<8x1xf32>
    %44 = math.exp %43 : vector<8x1xf32>
    %45 = math.log1p %44 : vector<8x1xf32>
    %46 = arith.addf %40, %45 : vector<8x1xf32>
    %47 = tpu.transpose %46, [1, 0] : vector<8x1xf32> -> vector<1x8xf32>
    %c0_19 = arith.constant 0 : index
    %c0_20 = arith.constant 0 : index
    %48 = vector.load %arg5[%c0_19, %c0_20] : memref<1x8xf32, #tpu.memory_space<vmem>>, vector<1x8xf32>
    tpu.vector_store %arg5[%c0_19, %c0_20], %47 {strides = array<i32>} : memref<1x8xf32, #tpu.memory_space<vmem>>, vector<1x8xf32>,
    return
  }
  func.func @transform_0(%arg0: i32) -> (i32, i32) {
    %c0_i32 = arith.constant 0 : i32
    %c0_i32_0 = arith.constant 0 : i32
    return %arg0, %c0_i32 : i32, i32
  }
  func.func @transform_1(%arg0: i32) -> (i32, i32) {
    %c0_i32 = arith.constant 0 : i32
    %c0_i32_0 = arith.constant 0 : i32
    return %arg0, %c0_i32 : i32, i32
  }
  func.func @transform_2(%arg0: i32) -> (i32, i32) {
    %c0_i32 = arith.constant 0 : i32
    %c0_i32_0 = arith.constant 0 : i32
    return %arg0, %c0_i32 : i32, i32
  }
  func.func @transform_3(%arg0: i32) -> (i32, i32) {
    %c0_i32 = arith.constant 0 : i32
    %c0_i32_0 = arith.constant 0 : i32
    return %arg0, %c0_i32 : i32, i32
  }
  func.func @transform_4(%arg0: i32) -> (i32, i32) {
    %c0_i32 = arith.constant 0 : i32
    %c0_i32_0 = arith.constant 0 : i32
    return %c0_i32, %arg0 : i32, i32
  }
}

</mosaic_0001>

<bundles_post_ra>
// kernel: tpu_custom_call.1
= control target key start
LH: loop header
LB: loop body
LE: loop exit
PB: predicated region body
PF: predicated region fallthrough
CT: control target
= control target key end

     0   :  { %9 = vsyncpa [#allocation3], 0  ;;  %s380_s0 = inlined_call_operand.hbm [shape: f32[8,128], index: 0, kind: input, shape index: {}]   ;;  %s381_s1 = inlined_call_operand.hbm [shape: f32[8,128], index: 1, kind: input, shape index: {}]   ;;  %s382_s2 = inlined_call_operand.hbm [shape: f32[8,128], index: 2, kind: input, shape index: {}]   ;;  %s383_s3 = inlined_call_operand.hbm [shape: f32[8,128], index: 3, kind: input, shape index: {}]   ;;  %s384_s4 = inlined_call_operand.hbm [shape: f32[1,8], index: 4, kind: output, shape index: {}]  }
   0x1   :  { %10 = vsyncpa [#allocation6], 0 }
   0x2   :  { %11 = vsyncpa [#allocation9], 0  ;;  %s29_s17 = sshll.u32 %s381_s1, 4  ;;  %s30_s17 = int_to_ptr.hbm [resolvable:$true] %s29_s17 }
   0x3   :  { %12 = vsyncpa [#allocation4], 0  ;;  %s335_s18 = smov [#allocation5]   ;;  %s18_s22 = sshll.u32 %s380_s0, 4  ;;  %s19_s22 = int_to_ptr.hbm [resolvable:$true] %s18_s22 }
   0x4   :  { %s31_s19 = sshll.u32 %s335_s18, 4  ;;  %s336_s23 = smov [#allocation2]   ;;  %s32_s19 = int_to_ptr.vmem [resolvable:$true] %s31_s19 }
   0x5   :  { %34 = dma.hbm_to_vmem [thread:$0]  %s30_s17, 128, %s32_s19, [#allocation6]  }
   0x6   :  { %s20_s24 = sshll.u32 %s336_s23, 4  ;;  %s40_s27 = sshll.u32 %s382_s2, 4  ;;  %s21_s24 = int_to_ptr.vmem [resolvable:$true] %s20_s24  ;;  %s41_s27 = int_to_ptr.hbm [resolvable:$true] %s40_s27 }
   0x7   :  { %23 = dma.hbm_to_vmem [thread:$0]  %s19_s22, 128, %s21_s24, [#allocation3]  }
   0x8   :  { %s51_s29 = sshll.u32 %s383_s3, 4  ;;  %s337_s30 = smov [#allocation7]   ;;  %s52_s29 = int_to_ptr.hbm [resolvable:$true] %s51_s29 }
   0x9   :  { %s42_s5 = sshll.u32 %s337_s30, 4  ;;  %s338_s0 = smov [#allocation8]   ;;  %s43_s5 = int_to_ptr.vmem [resolvable:$true] %s42_s5 }
   0xa   :  { %45 = dma.hbm_to_vmem [thread:$0]  %s41_s27, 128, %s43_s5, [#allocation6]  }
   0xb   :  { %s53_s6 = sshll.u32 %s338_s0, 4  ;;  %s54_s6 = int_to_ptr.vmem [resolvable:$true] %s53_s6 }
   0xc   :  { %56 = dma.hbm_to_vmem [thread:$0]  %s52_s29, 128, %s54_s6, [#allocation9]  }
   0xd   :  { %327 = dma.done.wait [#allocation3], 128  }
   0xe   :  { %328 = vsyncadd [#allocation3], 4294967168 }
   0xf   :  { %329 = dma.done.wait [#allocation6], 256  }
  0x10   :  { %330 = vsyncadd [#allocation6], 4294967040 }
  0x11   :  { %331 = dma.done.wait [#allocation9], 128  }
  0x12   :  { %332 = vsyncadd [#allocation9], 4294967168  ;;  %v75_v0 = vld [vmem:[#allocation7] sm:$0xff]  ;;  %v73_v1 = vld [vmem:[#allocation2] sm:$0xff]  ;;  %s339_s2 = smov [#allocation10]   ;;  %s181_s9 = sshll.u32 %s384_s4, 4  ;;  %s182_s9 = int_to_ptr.hbm [resolvable:$true] %s181_s9 }
  0x13   :  { %v103_v2 = vmul.f32 %v75_v0, %v75_v0  ;;  %v80_v3 = vmul.f32 %v73_v1, %v73_v1  ;;  %v74_v4 = vld [vmem:[#allocation5] sm:$0xff]  ;;  %v76_v6 = vld [vmem:[#allocation8] sm:$0xff]  ;;  %s179_s3 = sshll.u32 %s339_s2, 4  ;;  %vm172_vm7 = vcmask 57344   ;;  %s180_s3 = int_to_ptr.vmem [resolvable:$true] %s179_s3 }
  0x14   :  { %v77_v5 = vmul.f32 %v74_v4, %v73_v1  ;;  %v106_v7 = vmul.f32 %v76_v6, %v76_v6  ;;  %v83_v8 = vmul.f32 %v74_v4, %v74_v4  ;;  %v100_v9 = vmul.f32 %v76_v6, %v75_v0 }
  0x15   :  { %104 = vadd.xlane.f32.xlu1 %v103_v2  ;;  %81 = vadd.xlane.f32.xlu0 %v80_v3 }
  0x16   :  { %78 = vadd.xlane.f32.xlu2 %v77_v5 }
  0x1d   :  { %107 = vadd.xlane.f32.xlu1 %v106_v7  ;;  %84 = vadd.xlane.f32.xlu0 %v83_v8 }
  0x1e   :  { %101 = vadd.xlane.f32.xlu2 %v100_v9 }
  0x88   :  { %v105_v10 = vpop.xlane.xlu1 %104  ;;  %v82_v11 = vpop.xlane.xlu0 %81 }
  0x89   :  { %v109_v12 = vmax.f32 %v105_v10, 1e-16  ;;  %v86_v15 = vmax.f32 %v82_v11, 1e-16  ;;  %v79_v20 = vpop.xlane.xlu2 %78 }
  0x90   :  { %v108_v13 = vpop.xlane.xlu1 %107  ;;  %v85_v14 = vpop.xlane.xlu0 %84 }
  0x91   :  { %v110_v16 = vmax.f32 %v108_v13, 1e-16  ;;  %v87_v17 = vmax.f32 %v85_v14, 1e-16  ;;  %v102_v32 = vpop.xlane.xlu2 %101 }
  0x93   :  { %v111_v18 = vmul.f32 %v110_v16, %v109_v12  ;;  %v88_v19 = vmul.f32 %v87_v17, %v86_v15 }
  0x95   :  { %199 = vrsqrt.f32 %v111_v18  ;;  %vm118_vm2 = vweird.f32 %v111_v18  ;;  %vm95_vm3 = vweird.f32 %v88_v19 }
  0x96   :  { %201 = vrsqrt.f32 %v88_v19 }
  0x9b   :  { %v200_v21 = vpop.eup %199 }
  0x9c   :  { %v202_v22 = vpop.eup %201  ;;  %v113_v23 = vmul.f32 %v200_v21, %v111_v18  ;;  %vm119_vm0 = vweird.f32 %v200_v21 }
  0x9d   :  { %v90_v24 = vmul.f32 %v202_v22, %v88_v19  ;;  %vm96_vm1 = vweird.f32 %v202_v22  ;;  %vm120_vm4 = vmor %vm118_vm2, %vm119_vm0 }
  0x9e   :  { %v114_v25 = vmul.f32 %v200_v21, %v113_v23  ;;  %vm97_vm5 = vmor %vm95_vm3, %vm96_vm1 }
  0x9f   :  { %v91_v26 = vmul.f32 %v202_v22, %v90_v24 }
  0xa0   :  { %v115_v27 = vmul.f32 0.5, %v114_v25 }
  0xa1   :  { %v92_v28 = vmul.f32 0.5, %v91_v26 }
  0xa2   :  { %v116_v29 = vsub.f32 1.5, %v115_v27 }
  0xa3   :  { %v93_v30 = vsub.f32 1.5, %v92_v28 }
  0xa4   :  { %v117_v31 = vmul.f32 %v200_v21, %v116_v29 }
  0xa5   :  { %v94_v33 = vmul.f32 %v202_v22, %v93_v30 }
  0xa6   :  { %v121_v34 = vsel %vm120_vm4, %v200_v21, %v117_v31 }
  0xa7   :  { %v98_v35 = vsel %vm97_vm5, %v202_v22, %v94_v33  ;;  %v122_v36 = vmul.f32 %v121_v34, %v102_v32 }
  0xa8   :  { %v99_v37 = vmul.f32 %v98_v35, %v79_v20 }
  0xaa   :  { %v123_v38 = vsub.f32 %v122_v36, %v99_v37 }
  0xac   :  { %v124_v39 = vmul.f32 20.0, %v123_v38 }
  0xae   :  { %v126_v40 = vand.u32 2147483647, %v124_v39  ;;  %v125_v51 = vmax.f32 %v124_v39, 0.0 }
  0xb0   :  { %v127_v41 = vsub.f32 0.0, %v126_v40 }
  0xb2   :  { %v128_v42 = vmul.f32 1.442695, %v127_v41 }
  0xb4   :  { %203 = vpow2.f32 %v128_v42 }
  0xba   :  { %v204_v43 = vpop.eup %203 }
  0xbb   :  { %v130_v44 = vadd.f32 1.0, %v204_v43  ;;  %v133_v45 = vmul.f32 -0.5, %v204_v43  ;;  %v136_v47 = vand.u32 2147483647, %v204_v43 }
  0xbd   :  { %205 = vlog2.f32 %v130_v44  ;;  %v134_v46 = vadd.f32 1.0, %v133_v45  ;;  %vm137_vm6 = vcmp.lt.f32.partialorder %v136_v47, 0.0004427343 }
  0xbf   :  { %v135_v50 = vmul.f32 %v204_v43, %v134_v46 }
  0xc3   :  { %v206_v48 = vpop.eup %205 }
  0xc4   :  { %v132_v49 = vmul.f32 0.6931472, %v206_v48 }
  0xc6   :  { %v138_v52 = vsel %vm137_vm6, %v135_v50, %v132_v49 }
  0xc7   :  { %v139_v53 = vadd.f32 %v138_v52, %v125_v51 }
  0xc9   :  { %140 = vxpose.xlu0.b32.start.end [1/1] (short) (narrow) %v139_v53, 8 }
 0x16d   :  { %v156_v54 = vpop.trf.xlu0 }
 0x16e   :  { %173 = vst.msk [vmem:[#allocation10] sm:$0x1] %vm172_vm7, %v156_v54 }
 0x16f   :  { %184 = dma.vmem_to_hbm [thread:$0]  %s180_s3, 16, %s182_s9, [#allocation4]  }
 0x170   :  { %333 = dma.done.wait [#allocation4], 16  }
 0x171   :  { %334 = vsyncadd [#allocation4], 4294967280 }
 0x172   :  { %189 = vsyncpa [#allocation3], 1 }
 0x173   :  { %190 = vsyncpa [#allocation6], 1 }
 0x174   :  { %191 = vsyncpa [#allocation9], 1 }
 0x175   :  { %192 = vsyncpa [#allocation4], 1 }

</bundles_post_ra>
